<compile_context>
chip_gen: v7x
topology: tpu7x:2x2x1
jax: 0.10.0
libtpu: 0.0.40
codegen_flags: <defaults>
</compile_context>

<pallas_src>
import functools

import jax
import jax.numpy as jnp
from jax.experimental import pallas as pl
from jax.experimental.pallas import tpu as pltpu

D_IN = 784        # 28 * 28
D_HID = 500
D_OUT = 10
D_HID_PAD = 512   # 500 -> 512 (multiple of 128): unmasked MXU feed / stores
D_OUT_PAD = 128   # 10  -> 128: minimum lane-dense output width


def mlp_kernel(x_ref, w1_ref, b1_ref, w2_ref, b2_ref, o_ref):
    # x arrives in its native dtype; cast to bf16 in-kernel (VPU) so the
    # wrapper never does a separate cast/copy pass over x in HBM.
    x = x_ref[...].astype(jnp.bfloat16)
    # fc1 + ReLU: bf16 operands on the MXU, f32 accumulation.
    h = jnp.dot(x, w1_ref[...], preferred_element_type=jnp.float32)
    h = jnp.maximum(h + b1_ref[...], 0.0)               # (TM, 512) + (1, 512)
    # fc2
    y = jnp.dot(h.astype(jnp.bfloat16), w2_ref[...],
                preferred_element_type=jnp.float32)
    o_ref[...] = (y + b2_ref[...]).astype(o_ref.dtype)  # (TM, 128) + (1, 128)


def _round_up(n, m):
    return (n + m - 1) // m * m


def _choose_tm(batch, tm):
    """Pick the batch tile size.

    - Small batches: one block equal to the full batch (exact, no padding).
    - Medium batches (<= 2*tm): split into two tiles so the "parallel" batch
      axis can be sharded across v7x's two TensorCores (no-op on v5e/v6e).
    - Large batches: `tm` rows per tile (default 1024) so the ~0.35 us
      per-grid-step overhead is a small fraction of per-step work.
    """
    if batch <= 256:
        return batch
    if batch <= 2 * tm:
        return _round_up(-(-batch // 2), 8)
    return tm


def prepare_params(w1, b1, w2, b2):
    """One-time cast/pad of parameters to MXU-friendly layouts.

    w1: (784, 500), b1: (500,), w2: (500, 10), b2: (10,)  [(in, out) layout,
    i.e. the transpose of nn.Linear's weight].  Padded entries are zero so the
    math is unchanged; padded logit columns are sliced off in net_forward.
    Biases stay f32 (added after the f32-accumulated dot).
    """
    w1p = jnp.zeros((D_IN, D_HID_PAD), jnp.bfloat16).at[:, :D_HID].set(
        w1.astype(jnp.bfloat16))
    b1p = jnp.zeros((1, D_HID_PAD), jnp.float32).at[:, :D_HID].set(
        b1.reshape(1, D_HID).astype(jnp.float32))
    w2p = jnp.zeros((D_HID_PAD, D_OUT_PAD), jnp.bfloat16).at[:D_HID, :D_OUT].set(
        w2.astype(jnp.bfloat16))
    b2p = jnp.zeros((1, D_OUT_PAD), jnp.float32).at[:, :D_OUT].set(
        b2.reshape(1, D_OUT).astype(jnp.float32))
    return w1p, b1p, w2p, b2p


@functools.partial(jax.jit, static_argnames=("tm",))
def net_forward(x, params, *, tm=1024):
    """Pallas implementation of Net.forward.

    x: any shape whose trailing dims flatten to 784 (e.g. (B, 1, 28, 28)).
    params: output of prepare_params().
    Returns (B, 10) float32 logits.
    """
    w1p, b1p, w2p, b2p = params
    x2d = x.reshape(-1, D_IN)
    B = x2d.shape[0]

    TM = _choose_tm(B, tm)
    n_tiles = pl.cdiv(B, TM)
    B_pad = n_tiles * TM

    # Remainder-only fallback: typical batches (small B -> TM == B, or B a
    # multiple of the tile) skip this entirely, so x goes straight from HBM
    # into the kernel with no extra wrapper pass.
    # TODO(synk): drop this copy for ragged batches by relying on Pallas
    # out-of-bounds write masking for the last partial tile.
    if B_pad != B:
        x2d = jnp.zeros((B_pad, D_IN), x2d.dtype).at[:B].set(x2d)

    compiler_kwargs = dict(dimension_semantics=("parallel",))  # megacore split
    if TM >= 2048:
        # Large tiles brush v7x's 32 MiB scoped-VMEM default; ask for headroom.
        compiler_kwargs["vmem_limit_bytes"] = 48 * 1024 * 1024

    out = pl.pallas_call(
        mlp_kernel,
        out_shape=jax.ShapeDtypeStruct((B_pad, D_OUT_PAD), jnp.float32),
        grid=(n_tiles,),
        in_specs=[
            pl.BlockSpec((TM, D_IN), lambda i: (i, 0)),              # x streams
            pl.BlockSpec((D_IN, D_HID_PAD), lambda i: (0, 0)),       # w1 resident
            pl.BlockSpec((1, D_HID_PAD), lambda i: (0, 0)),          # b1 resident
            pl.BlockSpec((D_HID_PAD, D_OUT_PAD), lambda i: (0, 0)),  # w2 resident
            pl.BlockSpec((1, D_OUT_PAD), lambda i: (0, 0)),          # b2 resident
        ],
        out_specs=pl.BlockSpec((TM, D_OUT_PAD), lambda i: (i, 0)),
        compiler_params=pltpu.CompilerParams(**compiler_kwargs),
    )(x2d, w1p, b1p, w2p, b2p)

    return out[:B, :D_OUT]


def init_params(key):
    """Deterministic init mirroring nn.Linear default (uniform +/- 1/sqrt(fan_in))."""
    k1, k2, k3, k4 = jax.random.split(key, 4)
    bound1 = 1.0 / jnp.sqrt(784.0)
    bound2 = 1.0 / jnp.sqrt(500.0)
    # stored as (in, out) = transpose of PyTorch's (out, in) weight
    w1 = jax.random.uniform(k1, (784, 500), jnp.float32, -bound1, bound1)
    b1 = jax.random.uniform(k2, (500,), jnp.float32, -bound1, bound1)
    w2 = jax.random.uniform(k3, (500, 10), jnp.float32, -bound2, bound2)
    b2 = jax.random.uniform(k4, (10,), jnp.float32, -bound2, bound2)
    return w1, b1, w2, b2


if __name__ == "__main__":
    key = jax.random.PRNGKey(0)
    pkey, xkey, xkey2 = jax.random.split(key, 3)
    w1, b1, w2, b2 = init_params(pkey)

    # Pad/cast weights once (not on every forward call).
    params = prepare_params(w1, b1, w2, b2)
    jax.block_until_ready(params)

    # Small MNIST-like batch: (B, C, H, W) = (2, 1, 28, 28) -> flattens to (2, 784).
    x = jax.random.normal(xkey, (2, 1, 28, 28), jnp.float32)
    logits = net_forward(x, params)
    jax.block_until_ready(logits)

    ref = jnp.maximum(x.reshape(-1, D_IN) @ w1 + b1, 0.0) @ w2 + b2
    assert logits.shape == (2, D_OUT)
    assert jnp.allclose(logits, ref, atol=1e-1), "mismatch vs f32 reference (B=2)"

    # Second check: B=512 exercises the 2-tile grid / megacore path with
    # exact tiling and resident weights across grid steps.
    xb = jax.random.normal(xkey2, (512, 1, 28, 28), jnp.float32)
    logits_b = net_forward(xb, params)
    jax.block_until_ready(logits_b)
    ref_b = jnp.maximum(xb.reshape(-1, D_IN) @ w1 + b1, 0.0) @ w2 + b2
    assert logits_b.shape == (512, D_OUT)
    assert jnp.allclose(logits_b, ref_b, atol=1e-1), "mismatch vs f32 reference (B=512)"

    print("KERNEL_OK")
</pallas_src>

<mosaic_0001>
module attributes {stable_mosaic.version = 11 : i64} {
  func.func @mlp_kernel(%arg0: i32, %arg1: memref<2x784xf32, #tpu.memory_space<vmem>>, %arg2: memref<784x512xbf16, #tpu.memory_space<vmem>>, %arg3: memref<1x512xf32, #tpu.memory_space<vmem>>, %arg4: memref<512x128xbf16, #tpu.memory_space<vmem>>, %arg5: memref<1x128xf32, #tpu.memory_space<vmem>>, %arg6: memref<2x128xf32, #tpu.memory_space<vmem>>) attributes {dimension_semantics = [#tpu.dimension_semantics<parallel>], iteration_bounds = array<i64: 1>, scalar_prefetch = 0 : i64, scratch_operands = 0 : i64, tpu.core_type = #tpu.core_type<tc>, window_params = [{transform_indices = @transform_0, window_bounds = array<i64: 2, 784>}, {pipeline_mode = #tpu.pipeline_mode<synchronous>, transform_indices = @transform_1, window_bounds = array<i64: 784, 512>}, {pipeline_mode = #tpu.pipeline_mode<synchronous>, transform_indices = @transform_2, window_bounds = array<i64: 1, 512>}, {pipeline_mode = #tpu.pipeline_mode<synchronous>, transform_indices = @transform_3, window_bounds = array<i64: 512, 128>}, {pipeline_mode = #tpu.pipeline_mode<synchronous>, transform_indices = @transform_4, window_bounds = array<i64: 1, 128>}, {transform_indices = @transform_5, window_bounds = array<i64: 2, 128>}]} {
    %c0 = arith.constant 0 : index
    %c0_0 = arith.constant 0 : index
    %0 = vector.load %arg1[%c0, %c0_0] : memref<2x784xf32, #tpu.memory_space<vmem>>, vector<2x784xf32>
    %1 = arith.truncf %0 : vector<2x784xf32> to vector<2x784xbf16>
    %c0_1 = arith.constant 0 : index
    %c0_2 = arith.constant 0 : index
    %2 = vector.load %arg2[%c0_1, %c0_2] : memref<784x512xbf16, #tpu.memory_space<vmem>>, vector<784x512xbf16>
    %cst = arith.constant dense<0.000000e+00> : vector<2x512xf32>
    %3 = tpu.matmul %1, %2, %cst {dimension_numbers = #tpu.dot_dimension_numbers<[1], [0], [0], [1], [0, 0, 1, 1], [], []>} : vector<2x784xbf16>, vector<784x512xbf16>, vector<2x512xf32> -> vector<2x512xf32>
    %c0_3 = arith.constant 0 : index
    %c0_4 = arith.constant 0 : index
    %4 = vector.load %arg3[%c0_3, %c0_4] : memref<1x512xf32, #tpu.memory_space<vmem>>, vector<1x512xf32>
    %5 = vector.broadcast %4 : vector<1x512xf32> to vector<2x512xf32>
    %6 = arith.addf %3, %5 : vector<2x512xf32>
    %cst_5 = arith.constant 0.000000e+00 : f32
    %7 = vector.broadcast %cst_5 : f32 to vector<2x512xf32>
    %8 = arith.maximumf %6, %7 : vector<2x512xf32>
    %9 = arith.truncf %8 : vector<2x512xf32> to vector<2x512xbf16>
    %c0_6 = arith.constant 0 : index
    %c0_7 = arith.constant 0 : index
    %10 = vector.load %arg4[%c0_6, %c0_7] : memref<512x128xbf16, #tpu.memory_space<vmem>>, vector<512x128xbf16>
    %cst_8 = arith.constant dense<0.000000e+00> : vector<2x128xf32>
    %11 = tpu.matmul %9, %10, %cst_8 {dimension_numbers = #tpu.dot_dimension_numbers<[1], [0], [0], [1], [0, 0, 1, 1], [], []>} : vector<2x512xbf16>, vector<512x128xbf16>, vector<2x128xf32> -> vector<2x128xf32>
    %c0_9 = arith.constant 0 : index
    %c0_10 = arith.constant 0 : index
    %12 = vector.load %arg5[%c0_9, %c0_10] : memref<1x128xf32, #tpu.memory_space<vmem>>, vector<1x128xf32>
    %13 = vector.broadcast %12 : vector<1x128xf32> to vector<2x128xf32>
    %14 = arith.addf %11, %13 : vector<2x128xf32>
    %c0_11 = arith.constant 0 : index
    %c0_12 = arith.constant 0 : index
    %15 = vector.load %arg6[%c0_11, %c0_12] : memref<2x128xf32, #tpu.memory_space<vmem>>, vector<2x128xf32>
    tpu.vector_store %arg6[%c0_11, %c0_12], %14 {strides = array<i32>} : memref<2x128xf32, #tpu.memory_space<vmem>>, vector<2x128xf32>,
    return
  }
  func.func @transform_0(%arg0: i32) -> (i32, i32) {
    %c0_i32 = arith.constant 0 : i32
    %c0_i32_0 = arith.constant 0 : i32
    return %arg0, %c0_i32 : i32, i32
  }
  func.func @transform_1(%arg0: i32) -> (i32, i32) {
    %c0_i32 = arith.constant 0 : i32
    %c0_i32_0 = arith.constant 0 : i32
    %c0_i32_1 = arith.constant 0 : i32
    return %c0_i32, %c0_i32_0 : i32, i32
  }
  func.func @transform_2(%arg0: i32) -> (i32, i32) {
    %c0_i32 = arith.constant 0 : i32
    %c0_i32_0 = arith.constant 0 : i32
    %c0_i32_1 = arith.constant 0 : i32
    return %c0_i32, %c0_i32_0 : i32, i32
  }
  func.func @transform_3(%arg0: i32) -> (i32, i32) {
    %c0_i32 = arith.constant 0 : i32
    %c0_i32_0 = arith.constant 0 : i32
    %c0_i32_1 = arith.constant 0 : i32
    return %c0_i32, %c0_i32_0 : i32, i32
  }
  func.func @transform_4(%arg0: i32) -> (i32, i32) {
    %c0_i32 = arith.constant 0 : i32
    %c0_i32_0 = arith.constant 0 : i32
    %c0_i32_1 = arith.constant 0 : i32
    return %c0_i32, %c0_i32_0 : i32, i32
  }
  func.func @transform_5(%arg0: i32) -> (i32, i32) {
    %c0_i32 = arith.constant 0 : i32
    %c0_i32_0 = arith.constant 0 : i32
    return %arg0, %c0_i32 : i32, i32
  }
}

</mosaic_0001>

<bundles_post_ra>
// kernel: net_forward.1
= control target key start
LH: loop header
LB: loop body
LE: loop exit
PB: predicated region body
PF: predicated region fallthrough
CT: control target
= control target key end

     0   :  { %10 = vsyncpa [#allocation3], 0  ;;  %s2828_s0 = inlined_call_operand.vmem [shape: f32[2,784], index: 0, kind: input, shape index: {}]   ;;  %s2829_s1 = inlined_call_operand.hbm [shape: bf16[784,512], index: 1, kind: input, shape index: {}]   ;;  %s2830_s2 = inlined_call_operand.vmem [shape: f32[1,512], index: 2, kind: input, shape index: {}]   ;;  %s2831_s3 = inlined_call_operand.hbm [shape: bf16[512,128], index: 3, kind: input, shape index: {}]   ;;  %s2832_s4 = inlined_call_operand.vmem [shape: f32[1,128], index: 4, kind: input, shape index: {}]   ;;  %s2833_s5 = inlined_call_operand.hbm [shape: f32[2,128], index: 5, kind: output, shape index: {}]  }
   0x1   :  { %11 = vsyncpa [#allocation6], 0 }
   0x2   :  { %12 = vsyncpa [#allocation4], 0  ;;  %s2711_s18 = smov [#allocation2]   ;;  %s2639_s22 = scalar_lea.hbm %s2829_s1, 25088 }
   0x3   :  { %s20_s19 = sshll.u32 %s2711_s18, 4  ;;  %p2640_p0 = scmp.ne.s32.totalorder %s2829_s1, %s2639_s22  ;;  %s21_s19 = int_to_ptr.vmem [resolvable:$true] %s20_s19 }
   0x4   :  { %p2643_p1 = scmp.lt.u32.totalorder %s2639_s22, %s2829_s1 }
   0x6   :  { %p2645_p2 = pnand %p2643_p1, %p2640_p0 }
   0x8   :  { %2648 = shalt.err (!%p2645_p2)
}
   0x9   :  { %s2649_s27 = scalar_lea.vmem %s21_s19, 25088  ;;  %p2654_p4 = scmp.lt.s32.totalorder %s21_s19, %s21_s19 }
   0xa   :  { %p2650_p3 = scmp.ne.s32.totalorder %s21_s19, %s2649_s27  ;;  %p2655_p5 = scmp.lt.s32.totalorder %s2649_s27, %s2649_s27 }
   0xc   :  { %p2656_p6 = por %p2655_p5, %p2654_p4 }
   0xe   :  { %p2657_p7 = pnand %p2656_p6, %p2650_p3 }
  0x10   :  { %2660 = shalt.err (!%p2657_p7)
}
  0x11   :  { %s2712_s28 = smov 256   ;;  %s2713_s29 = smov 16  }
  0x12   :  { %26 = dma.hbm_to_vmem [thread:$0]  %s2829_s1, 25088, %s21_s19, [#allocation3], %s2712_s28, %s2712_s28, %s2713_s29  }
  0x13   :  { %s2714_s7 = smov [#allocation5]   ;;  %s2661_s11 = scalar_lea.hbm %s2831_s3, 4096 }
  0x14   :  { %s34_s8 = sshll.u32 %s2714_s7, 4  ;;  %p2662_p8 = scmp.ne.s32.totalorder %s2831_s3, %s2661_s11  ;;  %s35_s8 = int_to_ptr.vmem [resolvable:$true] %s34_s8 }
  0x15   :  { %p2665_p9 = scmp.lt.u32.totalorder %s2661_s11, %s2831_s3 }
  0x17   :  { %p2667_p10 = pnand %p2665_p9, %p2662_p8 }
  0x19   :  { %2670 = shalt.err (!%p2667_p10)
}
  0x1a   :  { %s2671_s16 = scalar_lea.vmem %s35_s8, 4096  ;;  %p2676_p12 = scmp.lt.s32.totalorder %s35_s8, %s35_s8 }
  0x1b   :  { %p2672_p11 = scmp.ne.s32.totalorder %s35_s8, %s2671_s16  ;;  %p2677_p13 = scmp.lt.s32.totalorder %s2671_s16, %s2671_s16 }
  0x1d   :  { %p2678_p0 = por %p2677_p13, %p2676_p12 }
  0x1f   :  { %p2679_p1 = pnand %p2678_p0, %p2672_p11 }
  0x21   :  { %2682 = shalt.err (!%p2679_p1)
}
  0x22   :  { %s2715_s1 = smov 64   ;;  %s2716_s17 = smov 4  }
  0x23   :  { %40 = dma.hbm_to_vmem [thread:$0]  %s2831_s3, 4096, %s35_s8, [#allocation6], %s2715_s1, %s2715_s1, %s2716_s17  }
  0x24   :  { %2705 = dma.done.wait [#allocation3], 25088  }
  0x25   :  { %2706 = vsyncadd [#allocation3], 4294942208 }
  0x26   :  { %2707 = dma.done.wait [#allocation6], 4096  }
  0x27   :  { %2708 = vsyncadd [#allocation6], 4294963200  ;;  %v2311_v0 = vld [vmem:[#allocation2 + $0x4] ss:$16 sps:$4 sm:$0xff]   ;;  %v2313_v1 = vld [vmem:[#allocation2 + $0xc] ss:$16 sps:$4 sm:$0xff]   ;;  %v58_v38 = vlaneseq }
  0x28   :  { %1303 = vmatprep.subr.bf16.mxu0 %v2311_v0  ;;  %v2315_v2 = vld [vmem:[#allocation2] ss:$16 sps:$4 sm:$0xff]   ;;  %v2316_v3 = vld [vmem:[#allocation2 + $0x8] ss:$16 sps:$4 sm:$0xff]   ;;  %1467 = vmatprep.subr.bf16.mxu1 %v2313_v1  ;;  %v2317_v4 = vld [vmem:[#allocation2 + $0x24] ss:$16 sps:$4 sm:$0xff]  }
  0x29   :  { %1304 = vmatpush1.bf16.msra.mxu0 %v2315_v2  ;;  %1468 = vmatpush1.bf16.msra.mxu1 %v2316_v3  ;;  %v2319_v5 = vld [vmem:[#allocation2 + $0x2c] ss:$16 sps:$4 sm:$0xff]   ;;  %v2321_v6 = vld [vmem:[#allocation2 + $0x20] ss:$16 sps:$4 sm:$0xff]   ;;  %v2322_v7 = vld [vmem:[#allocation2 + $0x28] ss:$16 sps:$4 sm:$0xff]  }
  0x2a   :  { %1305 = vmatprep.subr.bf16.mxu0 %v2317_v4  ;;  %1469 = vmatprep.subr.bf16.mxu1 %v2319_v5  ;;  %v2323_v8 = vld [vmem:[#allocation2 + $0x44] ss:$16 sps:$4 sm:$0xff]   ;;  %v2325_v9 = vld [vmem:[#allocation2 + $0x4c] ss:$16 sps:$4 sm:$0xff]   ;;  %v2327_v10 = vld [vmem:[#allocation2 + $0x40] ss:$16 sps:$4 sm:$0xff]  }
  0x2b   :  { %v2328_v11 = vld [vmem:[#allocation2 + $0x48] ss:$16 sps:$4 sm:$0xff]   ;;  %v2329_v12 = vld [vmem:[#allocation2 + $0x64] ss:$16 sps:$4 sm:$0xff]   ;;  %v2331_v13 = vld [vmem:[#allocation2 + $0x6c] ss:$16 sps:$4 sm:$0xff]  }
  0x2c   :  { %v2333_v14 = vld [vmem:[#allocation2 + $0x60] ss:$16 sps:$4 sm:$0xff]   ;;  %v2334_v15 = vld [vmem:[#allocation2 + $0x68] ss:$16 sps:$4 sm:$0xff]   ;;  %v2335_v16 = vld [vmem:[#allocation2 + $0x84] ss:$16 sps:$4 sm:$0xff]  }
  0x2d   :  { %1306 = vmatpush1.bf16.msra.mxu0 %v2321_v6  ;;  %1470 = vmatpush1.bf16.msra.mxu1 %v2322_v7  ;;  %v2337_v17 = vld [vmem:[#allocation2 + $0x8c] ss:$16 sps:$4 sm:$0xff]   ;;  %v2339_v18 = vld [vmem:[#allocation2 + $0x80] ss:$16 sps:$4 sm:$0xff]   ;;  %v2340_v19 = vld [vmem:[#allocation2 + $0x88] ss:$16 sps:$4 sm:$0xff]  }
  0x2e   :  { %1307 = vmatprep.subr.bf16.mxu0 %v2323_v8  ;;  %1471 = vmatprep.subr.bf16.mxu1 %v2325_v9  ;;  %v2341_v20 = vld [vmem:[#allocation2 + $0xa4] ss:$16 sps:$4 sm:$0xff]   ;;  %v2343_v21 = vld [vmem:[#allocation2 + $0xac] ss:$16 sps:$4 sm:$0xff]   ;;  %v2345_v22 = vld [vmem:[#allocation2 + $0xa0] ss:$16 sps:$4 sm:$0xff]  }
  0x2f   :  { %v2346_v23 = vld [vmem:[#allocation2 + $0xa8] ss:$16 sps:$4 sm:$0xff]   ;;  %v2347_v24 = vld [vmem:[#allocation2 + $0xc4] ss:$16 sps:$4 sm:$0xff]   ;;  %v2349_v25 = vld [vmem:[#allocation2 + $0xcc] ss:$16 sps:$4 sm:$0xff]  }
  0x30   :  { %v2351_v26 = vld [vmem:[#allocation2 + $0xc0] ss:$16 sps:$4 sm:$0xff]   ;;  %v2352_v27 = vld [vmem:[#allocation2 + $0xc8] ss:$16 sps:$4 sm:$0xff]   ;;  %v2353_v28 = vld [vmem:[#allocation2 + $0xe4] ss:$16 sps:$4 sm:$0xff]  }
  0x31   :  { %1308 = vmatpush1.bf16.msra.mxu0 %v2327_v10  ;;  %1472 = vmatpush1.bf16.msra.mxu1 %v2328_v11  ;;  %v2355_v29 = vld [vmem:[#allocation2 + $0xec] ss:$16 sps:$4 sm:$0xff]   ;;  %v2357_v30 = vld [vmem:[#allocation2 + $0xe0] ss:$16 sps:$4 sm:$0xff]   ;;  %v2358_v31 = vld [vmem:[#allocation2 + $0xe8] ss:$16 sps:$4 sm:$0xff]  }
  0x32   :  { %1309 = vmatprep.subr.bf16.mxu0 %v2329_v12  ;;  %1473 = vmatprep.subr.bf16.mxu1 %v2331_v13  ;;  %v2359_v32 = vld [vmem:[#allocation2 + $0x104] ss:$16 sps:$4 sm:$0xff]   ;;  %v2361_v33 = vld [vmem:[#allocation2 + $0x10c] ss:$16 sps:$4 sm:$0xff]   ;;  %v2363_v34 = vld [vmem:[#allocation2 + $0x100] ss:$16 sps:$4 sm:$0xff]  }
  0x33   :  { %v2364_v35 = vld [vmem:[#allocation2 + $0x108] ss:$16 sps:$4 sm:$0xff]   ;;  %v2717_v36 = vmov 1983009808   ;;  %v2365_v39 = vld [vmem:[#allocation2 + $0x124] ss:$16 sps:$4 sm:$0xff]  }
  0x34   :  { %v56_v37 = vunpack.c.l.s4 %v2717_v36  ;;  %v2367_v40 = vld [vmem:[#allocation2 + $0x12c] ss:$16 sps:$4 sm:$0xff]   ;;  %v2369_v41 = vld [vmem:[#allocation2 + $0x120] ss:$16 sps:$4 sm:$0xff]   ;;  %v2774_v43 = vshrl.u32 %v58_v38, 7  ;;  %vm1299_vm0 = vcmask 130048  }
  0x35   :  { %1310 = vmatpush1.bf16.msra.mxu0 %v2333_v14  ;;  %1474 = vmatpush1.bf16.msra.mxu1 %v2334_v15  ;;  %v2370_v44 = vld [vmem:[#allocation2 + $0x128] ss:$16 sps:$4 sm:$0xff]   ;;  %v2371_v45 = vld [vmem:[#allocation2 + $0x144] ss:$16 sps:$4 sm:$0xff]   ;;  %v2373_v46 = vld [vmem:[#allocation2 + $0x14c] ss:$16 sps:$4 sm:$0xff]  }
  0x36   :  { %1311 = vmatprep.subr.bf16.mxu0 %v2335_v16  ;;  %1475 = vmatprep.subr.bf16.mxu1 %v2337_v17  ;;  %v57_v42 = vunpack.c.0.s8 %v56_v37  ;;  %v2375_v47 = vld [vmem:[#allocation2 + $0x140] ss:$16 sps:$4 sm:$0xff]   ;;  %v2376_v48 = vld [vmem:[#allocation2 + $0x148] ss:$16 sps:$4 sm:$0xff]   ;;  %v2377_v50 = vld [vmem:[#allocation2 + $0x164] ss:$16 sps:$4 sm:$0xff]  }
  0x37   :  { %v2379_v51 = vld [vmem:[#allocation2 + $0x16c] ss:$16 sps:$4 sm:$0xff]   ;;  %v50_v52 = vld [vmem:[%s2828_s0] sm:$0xff]  ;;  %v2382_v55 = vld [vmem:[#allocation2 + $0x168] ss:$16 sps:$4 sm:$0xff]   ;;  %s2719_s25 = smov [#allocation7]  }
  0x38   :  { %v2777_v49 = vsub.s32 %v57_v42, %v2774_v43  ;;  %v2381_v53 = vld [vmem:[#allocation2 + $0x160] ss:$16 sps:$4 sm:$0xff]   ;;  %v2383_v56 = vld [vmem:[#allocation2 + $0x184] ss:$16 sps:$4 sm:$0xff]   ;;  %v2385_v57 = vld [vmem:[#allocation2 + $0x18c] ss:$16 sps:$4 sm:$0xff]   ;;  %v54_v4 = vcombine.high %v50_v52, %v50_v52 }
  0x39   :  { %1312 = vmatpush1.bf16.msra.mxu0 %v2339_v18  ;;  %1476 = vmatpush1.bf16.msra.mxu1 %v2340_v19  ;;  %v2387_v59 = vld [vmem:[#allocation2 + $0x180] ss:$16 sps:$4 sm:$0xff]   ;;  %v2388_v61 = vld [vmem:[#allocation2 + $0x188] ss:$16 sps:$4 sm:$0xff]   ;;  %v2389_v62 = vld [vmem:[#allocation2 + $0x1a4] ss:$16 sps:$4 sm:$0xff]  }
  0x3a   :  { %1313 = vmatprep.subr.bf16.mxu0 %v2341_v20  ;;  %1477 = vmatprep.subr.bf16.mxu1 %v2343_v21  ;;  %v61_v54 = vrot.slane %v50_v52, %v2777_v49  ;;  %v2391_v63 = vld [vmem:[#allocation2 + $0x1ac] ss:$16 sps:$4 sm:$0xff]   ;;  %v2393_v0 = vld [vmem:[#allocation2 + $0x1a0] ss:$16 sps:$4 sm:$0xff]   ;;  %v2394_v1 = vld [vmem:[#allocation2 + $0x1a8] ss:$16 sps:$4 sm:$0xff]   ;;  %v2784_v9 = vrot.slane %v54_v4, %v2777_v49 }
  0x3b   :  { %v2395_v2 = vld [vmem:[#allocation2 + $0x1c4] ss:$16 sps:$4 sm:$0xff]   ;;  %v2397_v3 = vld [vmem:[#allocation2 + $0x1cc] ss:$16 sps:$4 sm:$0xff]   ;;  %v2399_v5 = vld [vmem:[#allocation2 + $0x1c0] ss:$16 sps:$4 sm:$0xff]  }
  0x3c   :  { %v69_v58 = vcombine.high %v61_v54, %v61_v54  ;;  %v2400_v6 = vld [vmem:[#allocation2 + $0x1c8] ss:$16 sps:$4 sm:$0xff]   ;;  %v2401_v7 = vld [vmem:[#allocation2 + $0x1e4] ss:$16 sps:$4 sm:$0xff]   ;;  %v2403_v8 = vld [vmem:[#allocation2 + $0x1ec] ss:$16 sps:$4 sm:$0xff]   ;;  %v70_v14 = vcombine.high %v2784_v9, %v2784_v9  ;;  %v94_v16 = vpack.c.bf16 %v61_v54, %v61_v54 }
  0x3d   :  { %1314 = vmatpush1.bf16.msra.mxu0 %v2345_v22  ;;  %1478 = vmatpush1.bf16.msra.mxu1 %v2346_v23  ;;  %v2405_v10 = vld [vmem:[#allocation2 + $0x1e0] ss:$16 sps:$4 sm:$0xff]   ;;  %v2406_v11 = vld [vmem:[#allocation2 + $0x1e8] ss:$16 sps:$4 sm:$0xff]   ;;  %v2410_v12 = vld [vmem:[#allocation2 + $0x204] ss:$16 sps:$4 sm:$0xff]  }
  0x3e   :  { %1315 = vmatprep.subr.bf16.mxu0 %v2347_v24  ;;  %1479 = vmatprep.subr.bf16.mxu1 %v2349_v25  ;;  %v95_v60 = vpack.c.bf16 %v69_v58, %v69_v58  ;;  %v2413_v13 = vld [vmem:[#allocation2 + $0x20c] ss:$16 sps:$4 sm:$0xff]   ;;  %v2408_v15 = vld [vmem:[#allocation2 + $0x200] ss:$16 sps:$4 sm:$0xff]   ;;  %v2411_v17 = vld [vmem:[#allocation2 + $0x208] ss:$16 sps:$4 sm:$0xff]   ;;  %v97_v20 = vpack.c.bf16 %v70_v14, %v70_v14 }
  0x3f   :  { %v2416_v18 = vld [vmem:[#allocation2 + $0x224] ss:$16 sps:$4 sm:$0xff]   ;;  %v2419_v19 = vld [vmem:[#allocation2 + $0x22c] ss:$16 sps:$4 sm:$0xff]   ;;  %v2414_v21 = vld [vmem:[#allocation2 + $0x220] ss:$16 sps:$4 sm:$0xff]  }
  0x40   :  { %1335 = vmatprep.mubr.bf16.mxu0 %v95_v60  ;;  %1499 = vmatprep.mubr.bf16.mxu1 %v95_v60  ;;  %v2417_v22 = vld [vmem:[#allocation2 + $0x228] ss:$16 sps:$4 sm:$0xff]   ;;  %v2422_v23 = vld [vmem:[#allocation2 + $0x244] ss:$16 sps:$4 sm:$0xff]   ;;  %v2425_v24 = vld [vmem:[#allocation2 + $0x24c] ss:$16 sps:$4 sm:$0xff]  }
  0x41   :  { %1316 = vmatpush1.bf16.msra.mxu0 %v2351_v26  ;;  %1480 = vmatpush1.bf16.msra.mxu1 %v2352_v27  ;;  %v2420_v25 = vld [vmem:[#allocation2 + $0x240] ss:$16 sps:$4 sm:$0xff]   ;;  %v2423_v26 = vld [vmem:[#allocation2 + $0x248] ss:$16 sps:$4 sm:$0xff]   ;;  %v2428_v27 = vld [vmem:[#allocation2 + $0x264] ss:$16 sps:$4 sm:$0xff]  }
  0x42   :  { %1317 = vmatprep.subr.bf16.mxu0 %v2353_v28  ;;  %1481 = vmatprep.subr.bf16.mxu1 %v2355_v29  ;;  %v2431_v28 = vld [vmem:[#allocation2 + $0x26c] ss:$16 sps:$4 sm:$0xff]   ;;  %v2426_v29 = vld [vmem:[#allocation2 + $0x260] ss:$16 sps:$4 sm:$0xff]   ;;  %v2441_v38 = vld [vmem:[#allocation2 + $0x2a8] ss:$16 sps:$4 sm:$0xff]  }
  0x43   :  { %v2443_v36 = vld [vmem:[#allocation2 + $0x2ac] ss:$16 sps:$4 sm:$0xff]   ;;  %v2438_v37 = vld [vmem:[#allocation2 + $0x2a0] ss:$16 sps:$4 sm:$0xff]   ;;  %v2447_v42 = vld [vmem:[#allocation2 + $0x2c8] ss:$16 sps:$4 sm:$0xff]  }
  0x44   :  { %v2459_v52 = vld [vmem:[#allocation2 + $0x308] ss:$16 sps:$4 sm:$0xff]   ;;  %v2467_v54 = vld [vmem:[#allocation2 + $0x32c] ss:$16 sps:$4 sm:$0xff]   ;;  %v2500_v14 = vld [vmem:[#allocation2 + $0x3e4] ss:$16 sps:$4 sm:$0xff]  }
  0x45   :  { %1318 = vmatpush1.bf16.msra.mxu0 %v2357_v30  ;;  %1482 = vmatpush1.bf16.msra.mxu1 %v2358_v31  ;;  %v2429_v30 = vld [vmem:[#allocation2 + $0x268] ss:$16 sps:$4 sm:$0xff]   ;;  %v2434_v31 = vld [vmem:[#allocation2 + $0x284] ss:$16 sps:$4 sm:$0xff]   ;;  %v2473_v58 = vld [vmem:[#allocation2 + $0x34c] ss:$16 sps:$4 sm:$0xff]  }
  0x46   :  { %1319 = vmatprep.subr.bf16.mxu0 %v2359_v32  ;;  %1483 = vmatprep.subr.bf16.mxu1 %v2361_v33  ;;  %v2437_v32 = vld [vmem:[#allocation2 + $0x28c] ss:$16 sps:$4 sm:$0xff]   ;;  %v2432_v33 = vld [vmem:[#allocation2 + $0x280] ss:$16 sps:$4 sm:$0xff]   ;;  %v2471_v60 = vld [vmem:[#allocation2 + $0x348] ss:$16 sps:$4 sm:$0xff]  }
  0x47   :  { %v2483_v4 = vld [vmem:[#allocation2 + $0x388] ss:$16 sps:$4 sm:$0xff]   ;;  %s1989_s26 = sshll.u32 %s2719_s25, 4  ;;  %s1990_s26 = int_to_ptr.vmem [resolvable:$true] %s1989_s26 }
  0x48   :  { %s2683_s27 = scalar_lea.vmem %s1990_s26, 32  ;;  %p2688_p3 = scmp.lt.s32.totalorder %s1990_s26, %s1990_s26 }
  0x49   :  { %1320 = vmatpush1.bf16.msra.mxu0 %v2363_v34  ;;  %1484 = vmatpush1.bf16.msra.mxu1 %v2364_v35  ;;  %v2435_v34 = vld [vmem:[#allocation2 + $0x288] ss:$16 sps:$4 sm:$0xff]   ;;  %v2440_v35 = vld [vmem:[#allocation2 + $0x2a4] ss:$16 sps:$4 sm:$0xff]   ;;  %p2684_p2 = scmp.ne.s32.totalorder %s1990_s26, %s2683_s27  ;;  %p2689_p4 = scmp.lt.s32.totalorder %s2683_s27, %s2683_s27 }
  0x4a   :  { %1321 = vmatprep.subr.bf16.mxu0 %v2365_v39  ;;  %1485 = vmatprep.subr.bf16.mxu1 %v2367_v40  ;;  %v2446_v39 = vld [vmem:[#allocation2 + $0x2c4] ss:$16 sps:$4 sm:$0xff]   ;;  %v2449_v40 = vld [vmem:[#allocation2 + $0x2cc] ss:$16 sps:$4 sm:$0xff]  }
  0x4b   :  { %p2690_p5 = por %p2689_p4, %p2688_p3 }
  0x4d   :  { %1322 = vmatpush1.bf16.msra.mxu0 %v2369_v41  ;;  %1486 = vmatpush1.bf16.msra.mxu1 %v2370_v44  ;;  %v2444_v41 = vld [vmem:[#allocation2 + $0x2c0] ss:$16 sps:$4 sm:$0xff]   ;;  %v2452_v44 = vld [vmem:[#allocation2 + $0x2e4] ss:$16 sps:$4 sm:$0xff]   ;;  %p2691_p6 = pnand %p2690_p5, %p2684_p2 }
  0x4e   :  { %1323 = vmatprep.subr.bf16.mxu0 %v2371_v45  ;;  %1487 = vmatprep.subr.bf16.mxu1 %v2373_v46  ;;  %v2455_v45 = vld [vmem:[#allocation2 + $0x2ec] ss:$16 sps:$4 sm:$0xff]   ;;  %v2450_v46 = vld [vmem:[#allocation2 + $0x2e0] ss:$16 sps:$4 sm:$0xff]  }
  0x51   :  { %1324 = vmatpush1.bf16.msra.mxu0 %v2375_v47  ;;  %1488 = vmatpush1.bf16.msra.mxu1 %v2376_v48  ;;  %v2453_v47 = vld [vmem:[#allocation2 + $0x2e8] ss:$16 sps:$4 sm:$0xff]   ;;  %v2458_v48 = vld [vmem:[#allocation2 + $0x304] ss:$16 sps:$4 sm:$0xff]  }
  0x52   :  { %1325 = vmatprep.subr.bf16.mxu0 %v2377_v50  ;;  %1489 = vmatprep.subr.bf16.mxu1 %v2379_v51  ;;  %v2461_v50 = vld [vmem:[#allocation2 + $0x30c] ss:$16 sps:$4 sm:$0xff]   ;;  %v2456_v51 = vld [vmem:[#allocation2 + $0x300] ss:$16 sps:$4 sm:$0xff]  }
  0x55   :  { %1326 = vmatpush1.bf16.msra.mxu0 %v2381_v53  ;;  %1490 = vmatpush1.bf16.msra.mxu1 %v2382_v55  ;;  %v2464_v53 = vld [vmem:[#allocation2 + $0x324] ss:$16 sps:$4 sm:$0xff]   ;;  %v2462_v55 = vld [vmem:[#allocation2 + $0x320] ss:$16 sps:$4 sm:$0xff]  }
  0x56   :  { %1327 = vmatprep.subr.bf16.mxu0 %v2383_v56  ;;  %1491 = vmatprep.subr.bf16.mxu1 %v2385_v57  ;;  %v2465_v56 = vld [vmem:[#allocation2 + $0x328] ss:$16 sps:$4 sm:$0xff]   ;;  %v2470_v57 = vld [vmem:[#allocation2 + $0x344] ss:$16 sps:$4 sm:$0xff]  }
  0x59   :  { %1328 = vmatpush1.bf16.msra.mxu0 %v2387_v59  ;;  %1492 = vmatpush1.bf16.msra.mxu1 %v2388_v61  ;;  %v2468_v59 = vld [vmem:[#allocation2 + $0x340] ss:$16 sps:$4 sm:$0xff]   ;;  %v2476_v61 = vld [vmem:[#allocation2 + $0x364] ss:$16 sps:$4 sm:$0xff]  }
  0x5a   :  { %1329 = vmatprep.subr.bf16.mxu0 %v2389_v62  ;;  %1493 = vmatprep.subr.bf16.mxu1 %v2391_v63  ;;  %v2479_v62 = vld [vmem:[#allocation2 + $0x36c] ss:$16 sps:$4 sm:$0xff]   ;;  %v2474_v63 = vld [vmem:[#allocation2 + $0x360] ss:$16 sps:$4 sm:$0xff]  }
  0x5d   :  { %1330 = vmatpush1.bf16.msra.mxu0 %v2393_v0  ;;  %1494 = vmatpush1.bf16.msra.mxu1 %v2394_v1  ;;  %v2477_v0 = vld [vmem:[#allocation2 + $0x368] ss:$16 sps:$4 sm:$0xff]   ;;  %v2482_v1 = vld [vmem:[#allocation2 + $0x384] ss:$16 sps:$4 sm:$0xff]  }
  0x5e   :  { %1331 = vmatprep.subr.bf16.mxu0 %v2395_v2  ;;  %1495 = vmatprep.subr.bf16.mxu1 %v2397_v3  ;;  %v2485_v2 = vld [vmem:[#allocation2 + $0x38c] ss:$16 sps:$4 sm:$0xff]   ;;  %v2480_v3 = vld [vmem:[#allocation2 + $0x380] ss:$16 sps:$4 sm:$0xff]  }
  0x61   :  { %1332 = vmatpush1.bf16.msra.mxu0 %v2399_v5  ;;  %1496 = vmatpush1.bf16.msra.mxu1 %v2400_v6  ;;  %v2488_v5 = vld [vmem:[#allocation2 + $0x3a4] ss:$16 sps:$4 sm:$0xff]   ;;  %v2491_v6 = vld [vmem:[#allocation2 + $0x3ac] ss:$16 sps:$4 sm:$0xff]  }
  0x62   :  { %1333 = vmatprep.subr.bf16.mxu0 %v2401_v7  ;;  %1497 = vmatprep.subr.bf16.mxu1 %v2403_v8  ;;  %v2486_v7 = vld [vmem:[#allocation2 + $0x3a0] ss:$16 sps:$4 sm:$0xff]   ;;  %v2489_v8 = vld [vmem:[#allocation2 + $0x3a8] ss:$16 sps:$4 sm:$0xff]  }
  0x65   :  { %1334 = vmatpush1.bf16.msra.mxu0 %v2405_v10  ;;  %1498 = vmatpush1.bf16.msra.mxu1 %v2406_v11  ;;  %v2494_v10 = vld [vmem:[#allocation2 + $0x3c4] ss:$16 sps:$4 sm:$0xff]   ;;  %v2497_v11 = vld [vmem:[#allocation2 + $0x3cc] ss:$16 sps:$4 sm:$0xff]  }
  0x66   :  { %1344 = vmatprep.subr.bf16.mxu0 %v2410_v12  ;;  %1508 = vmatprep.subr.bf16.mxu1 %v2413_v13  ;;  %v2492_v12 = vld [vmem:[#allocation2 + $0x3c0] ss:$16 sps:$4 sm:$0xff]   ;;  %v2495_v13 = vld [vmem:[#allocation2 + $0x3c8] ss:$16 sps:$4 sm:$0xff]  }
  0x68   :  { %1336 = vmatmul.mubr.bf16.vlgmr.msra.gmra.mrb[0].mxu0 %v94_v16  ;;  %1500 = vmatmul.mubr.bf16.vlgmr.msra.gmra.mrb[0].mxu1 %v94_v16  ;;  %v2498_v16 = vld [vmem:[#allocation2 + $0x3e0] ss:$16 sps:$4 sm:$0xff]  }
  0x69   :  { %1345 = vmatpush1.bf16.msra.mxu0 %v2408_v15  ;;  %1509 = vmatpush1.bf16.msra.mxu1 %v2411_v17  ;;  %v2503_v15 = vld [vmem:[#allocation2 + $0x3ec] ss:$16 sps:$4 sm:$0xff]   ;;  %v2501_v17 = vld [vmem:[#allocation2 + $0x3e8] ss:$16 sps:$4 sm:$0xff]  }
  0x6a   :  { %1346 = vmatprep.subr.bf16.mxu0 %v2416_v18  ;;  %1510 = vmatprep.subr.bf16.mxu1 %v2419_v19  ;;  %v2506_v18 = vld [vmem:[#allocation2 + $0x404] ss:$16 sps:$4 sm:$0xff]   ;;  %v2509_v19 = vld [vmem:[#allocation2 + $0x40c] ss:$16 sps:$4 sm:$0xff]  }
  0x6b   :  { %1376 = vmatprep.mubr.bf16.mxu0 %v97_v20  ;;  %1540 = vmatprep.mubr.bf16.mxu1 %v97_v20  ;;  %v2504_v20 = vld [vmem:[#allocation2 + $0x400] ss:$16 sps:$4 sm:$0xff]  }
  0x6d   :  { %1347 = vmatpush1.bf16.msra.mxu0 %v2414_v21  ;;  %1511 = vmatpush1.bf16.msra.mxu1 %v2417_v22  ;;  %v96_v21 = vpack.c.bf16 %v2784_v9, %v2784_v9  ;;  %v2507_v22 = vld [vmem:[#allocation2 + $0x408] ss:$16 sps:$4 sm:$0xff]  }
  0x6e   :  { %1348 = vmatprep.subr.bf16.mxu0 %v2422_v23  ;;  %1512 = vmatprep.subr.bf16.mxu1 %v2425_v24  ;;  %v2793_v23 = vld [vmem:[%s2828_s0 + $0x8] sm:$0x3f]  ;;  %v2512_v24 = vld [vmem:[#allocation2 + $0x424] ss:$16 sps:$4 sm:$0xff]  }
  0x6f   :  { %v2513_v9 = vld [vmem:[#allocation2 + $0x428] ss:$16 sps:$4 sm:$0xff]  }
  0x71   :  { %1349 = vmatpush1.bf16.msra.mxu0 %v2420_v25  ;;  %1513 = vmatpush1.bf16.msra.mxu1 %v2423_v26  ;;  %v2515_v25 = vld [vmem:[#allocation2 + $0x42c] ss:$16 sps:$4 sm:$0xff]   ;;  %v2797_v26 = vrot.slane %v2793_v23, %v2777_v49 }
  0x72   :  { %1350 = vmatprep.subr.bf16.mxu0 %v2428_v27  ;;  %1514 = vmatprep.subr.bf16.mxu1 %v2431_v28  ;;  %v2510_v27 = vld [vmem:[#allocation2 + $0x420] ss:$16 sps:$4 sm:$0xff]  }
  0x73   :  { %v86_v28 = vcombine.high %v2797_v26, %v2797_v26 }
  0x75   :  { %1351 = vmatpush1.bf16.msra.mxu0 %v2426_v29  ;;  %1515 = vmatpush1.bf16.msra.mxu1 %v2429_v30  ;;  %v2518_v29 = vld [vmem:[#allocation2 + $0x444] ss:$16 sps:$4 sm:$0xff]   ;;  %v2521_v30 = vld [vmem:[#allocation2 + $0x44c] ss:$16 sps:$4 sm:$0xff]  }
  0x76   :  { %1352 = vmatprep.subr.bf16.mxu0 %v2434_v31  ;;  %1516 = vmatprep.subr.bf16.mxu1 %v2437_v32  ;;  %v99_v31 = vpack.c.bf16 %v86_v28, %v86_v28  ;;  %v2516_v32 = vld [vmem:[#allocation2 + $0x440] ss:$16 sps:$4 sm:$0xff]   ;;  %v98_v28 = vpack.c.bf16 %v2797_v26, %v2797_v26 }
  0x79   :  { %1353 = vmatpush1.bf16.msra.mxu0 %v2432_v33  ;;  %1517 = vmatpush1.bf16.msra.mxu1 %v2435_v34  ;;  %v2519_v33 = vld [vmem:[#allocation2 + $0x448] ss:$16 sps:$4 sm:$0xff]   ;;  %v2524_v34 = vld [vmem:[#allocation2 + $0x464] ss:$16 sps:$4 sm:$0xff]  }
  0x7a   :  { %1354 = vmatprep.subr.bf16.mxu0 %v2440_v35  ;;  %1518 = vmatprep.subr.bf16.mxu1 %v2443_v36  ;;  %v2527_v35 = vld [vmem:[#allocation2 + $0x46c] ss:$16 sps:$4 sm:$0xff]   ;;  %v2522_v36 = vld [vmem:[#allocation2 + $0x460] ss:$16 sps:$4 sm:$0xff]  }
  0x7d   :  { %1355 = vmatpush1.bf16.msra.mxu0 %v2438_v37  ;;  %1519 = vmatpush1.bf16.msra.mxu1 %v2441_v38  ;;  %v2525_v37 = vld [vmem:[#allocation2 + $0x468] ss:$16 sps:$4 sm:$0xff]   ;;  %v2530_v38 = vld [vmem:[#allocation2 + $0x484] ss:$16 sps:$4 sm:$0xff]  }
  0x7e   :  { %1356 = vmatprep.subr.bf16.mxu0 %v2446_v39  ;;  %1520 = vmatprep.subr.bf16.mxu1 %v2449_v40  ;;  %v2533_v39 = vld [vmem:[#allocation2 + $0x48c] ss:$16 sps:$4 sm:$0xff]   ;;  %v2528_v40 = vld [vmem:[#allocation2 + $0x480] ss:$16 sps:$4 sm:$0xff]  }
  0x81   :  { %1357 = vmatpush1.bf16.msra.mxu0 %v2444_v41  ;;  %1521 = vmatpush1.bf16.msra.mxu1 %v2447_v42  ;;  %v2531_v41 = vld [vmem:[#allocation2 + $0x488] ss:$16 sps:$4 sm:$0xff]   ;;  %v2536_v42 = vld [vmem:[#allocation2 + $0x4a4] ss:$16 sps:$4 sm:$0xff]  }
  0x82   :  { %1358 = vmatprep.subr.bf16.mxu0 %v2452_v44  ;;  %1522 = vmatprep.subr.bf16.mxu1 %v2455_v45  ;;  %v2539_v44 = vld [vmem:[#allocation2 + $0x4ac] ss:$16 sps:$4 sm:$0xff]   ;;  %v2534_v45 = vld [vmem:[#allocation2 + $0x4a0] ss:$16 sps:$4 sm:$0xff]  }
  0x85   :  { %1359 = vmatpush1.bf16.msra.mxu0 %v2450_v46  ;;  %1523 = vmatpush1.bf16.msra.mxu1 %v2453_v47  ;;  %v2537_v46 = vld [vmem:[#allocation2 + $0x4a8] ss:$16 sps:$4 sm:$0xff]   ;;  %v2542_v47 = vld [vmem:[#allocation2 + $0x4c4] ss:$16 sps:$4 sm:$0xff]  }
  0x86   :  { %1360 = vmatprep.subr.bf16.mxu0 %v2458_v48  ;;  %1524 = vmatprep.subr.bf16.mxu1 %v2461_v50  ;;  %v2545_v48 = vld [vmem:[#allocation2 + $0x4cc] ss:$16 sps:$4 sm:$0xff]   ;;  %v2540_v50 = vld [vmem:[#allocation2 + $0x4c0] ss:$16 sps:$4 sm:$0xff]  }
  0x89   :  { %1361 = vmatpush1.bf16.msra.mxu0 %v2456_v51  ;;  %1525 = vmatpush1.bf16.msra.mxu1 %v2459_v52  ;;  %v2543_v51 = vld [vmem:[#allocation2 + $0x4c8] ss:$16 sps:$4 sm:$0xff]   ;;  %v2548_v52 = vld [vmem:[#allocation2 + $0x4e4] ss:$16 sps:$4 sm:$0xff]  }
  0x8a   :  { %1362 = vmatprep.subr.bf16.mxu0 %v2464_v53  ;;  %1526 = vmatprep.subr.bf16.mxu1 %v2467_v54  ;;  %v2551_v53 = vld [vmem:[#allocation2 + $0x4ec] ss:$16 sps:$4 sm:$0xff]   ;;  %v2546_v54 = vld [vmem:[#allocation2 + $0x4e0] ss:$16 sps:$4 sm:$0xff]  }
  0x8d   :  { %1363 = vmatpush1.bf16.msra.mxu0 %v2462_v55  ;;  %1527 = vmatpush1.bf16.msra.mxu1 %v2465_v56  ;;  %v2549_v55 = vld [vmem:[#allocation2 + $0x4e8] ss:$16 sps:$4 sm:$0xff]   ;;  %v2554_v56 = vld [vmem:[#allocation2 + $0x504] ss:$16 sps:$4 sm:$0xff]  }
  0x8e   :  { %1364 = vmatprep.subr.bf16.mxu0 %v2470_v57  ;;  %1528 = vmatprep.subr.bf16.mxu1 %v2473_v58  ;;  %v2557_v57 = vld [vmem:[#allocation2 + $0x50c] ss:$16 sps:$4 sm:$0xff]   ;;  %v2552_v58 = vld [vmem:[#allocation2 + $0x500] ss:$16 sps:$4 sm:$0xff]  }
  0x91   :  { %1365 = vmatpush1.bf16.msra.mxu0 %v2468_v59  ;;  %1529 = vmatpush1.bf16.msra.mxu1 %v2471_v60  ;;  %v2555_v59 = vld [vmem:[#allocation2 + $0x508] ss:$16 sps:$4 sm:$0xff]   ;;  %v2560_v60 = vld [vmem:[#allocation2 + $0x524] ss:$16 sps:$4 sm:$0xff]  }
  0x92   :  { %1366 = vmatprep.subr.bf16.mxu0 %v2476_v61  ;;  %1530 = vmatprep.subr.bf16.mxu1 %v2479_v62  ;;  %v2563_v61 = vld [vmem:[#allocation2 + $0x52c] ss:$16 sps:$4 sm:$0xff]   ;;  %v2558_v62 = vld [vmem:[#allocation2 + $0x520] ss:$16 sps:$4 sm:$0xff]  }
  0x95   :  { %1367 = vmatpush1.bf16.msra.mxu0 %v2474_v63  ;;  %1531 = vmatpush1.bf16.msra.mxu1 %v2477_v0  ;;  %v2561_v63 = vld [vmem:[#allocation2 + $0x528] ss:$16 sps:$4 sm:$0xff]   ;;  %v2566_v0 = vld [vmem:[#allocation2 + $0x544] ss:$16 sps:$4 sm:$0xff]  }
  0x96   :  { %1368 = vmatprep.subr.bf16.mxu0 %v2482_v1  ;;  %1532 = vmatprep.subr.bf16.mxu1 %v2485_v2  ;;  %v2569_v1 = vld [vmem:[#allocation2 + $0x54c] ss:$16 sps:$4 sm:$0xff]   ;;  %v2564_v2 = vld [vmem:[#allocation2 + $0x540] ss:$16 sps:$4 sm:$0xff]  }
  0x99   :  { %1369 = vmatpush1.bf16.msra.mxu0 %v2480_v3  ;;  %1533 = vmatpush1.bf16.msra.mxu1 %v2483_v4  ;;  %v2567_v3 = vld [vmem:[#allocation2 + $0x548] ss:$16 sps:$4 sm:$0xff]   ;;  %v2572_v4 = vld [vmem:[#allocation2 + $0x564] ss:$16 sps:$4 sm:$0xff]  }
  0x9a   :  { %1370 = vmatprep.subr.bf16.mxu0 %v2488_v5  ;;  %1534 = vmatprep.subr.bf16.mxu1 %v2491_v6  ;;  %v2575_v5 = vld [vmem:[#allocation2 + $0x56c] ss:$16 sps:$4 sm:$0xff]   ;;  %v2570_v6 = vld [vmem:[#allocation2 + $0x560] ss:$16 sps:$4 sm:$0xff]  }
  0x9d   :  { %1371 = vmatpush1.bf16.msra.mxu0 %v2486_v7  ;;  %1535 = vmatpush1.bf16.msra.mxu1 %v2489_v8  ;;  %v2573_v7 = vld [vmem:[#allocation2 + $0x568] ss:$16 sps:$4 sm:$0xff]   ;;  %v2578_v8 = vld [vmem:[#allocation2 + $0x584] ss:$16 sps:$4 sm:$0xff]  }
  0x9e   :  { %1372 = vmatprep.subr.bf16.mxu0 %v2494_v10  ;;  %1536 = vmatprep.subr.bf16.mxu1 %v2497_v11  ;;  %v2581_v10 = vld [vmem:[#allocation2 + $0x58c] ss:$16 sps:$4 sm:$0xff]   ;;  %v2576_v11 = vld [vmem:[#allocation2 + $0x580] ss:$16 sps:$4 sm:$0xff]  }
  0xa1   :  { %1373 = vmatpush1.bf16.msra.mxu0 %v2492_v12  ;;  %1537 = vmatpush1.bf16.msra.mxu1 %v2495_v13  ;;  %v2579_v12 = vld [vmem:[#allocation2 + $0x588] ss:$16 sps:$4 sm:$0xff]   ;;  %v2584_v13 = vld [vmem:[#allocation2 + $0x5a4] ss:$16 sps:$4 sm:$0xff]  }
  0xa2   :  { %1374 = vmatprep.subr.bf16.mxu0 %v2500_v14  ;;  %1538 = vmatprep.subr.bf16.mxu1 %v2503_v15  ;;  %v2587_v14 = vld [vmem:[#allocation2 + $0x5ac] ss:$16 sps:$4 sm:$0xff]   ;;  %v2582_v15 = vld [vmem:[#allocation2 + $0x5a0] ss:$16 sps:$4 sm:$0xff]  }
  0xa5   :  { %1375 = vmatpush1.bf16.msra.mxu0 %v2498_v16  ;;  %1539 = vmatpush1.bf16.msra.mxu1 %v2501_v17  ;;  %v2585_v16 = vld [vmem:[#allocation2 + $0x5a8] ss:$16 sps:$4 sm:$0xff]   ;;  %v2590_v17 = vld [vmem:[#allocation2 + $0x5c4] ss:$16 sps:$4 sm:$0xff]  }
  0xa6   :  { %1385 = vmatprep.subr.bf16.mxu0 %v2506_v18  ;;  %1549 = vmatprep.subr.bf16.mxu1 %v2509_v19  ;;  %v2593_v18 = vld [vmem:[#allocation2 + $0x5cc] ss:$16 sps:$4 sm:$0xff]   ;;  %v2588_v19 = vld [vmem:[#allocation2 + $0x5c0] ss:$16 sps:$4 sm:$0xff]  }
  0xa8   :  { %1377 = vmatmul.mubr.bf16.vlgmr.msra.gmra.mrb[0].mxu0 %v96_v21  ;;  %1541 = vmatmul.mubr.bf16.vlgmr.msra.gmra.mrb[0].mxu1 %v96_v21  ;;  %v2596_v21 = vld [vmem:[#allocation2 + $0x5e4] ss:$16 sps:$4 sm:$0xff]  }
  0xa9   :  { %1386 = vmatpush1.bf16.msra.mxu0 %v2504_v20  ;;  %1550 = vmatpush1.bf16.msra.mxu1 %v2507_v22  ;;  %v2591_v20 = vld [vmem:[#allocation2 + $0x5c8] ss:$16 sps:$4 sm:$0xff]   ;;  %v2599_v22 = vld [vmem:[#allocation2 + $0x5ec] ss:$16 sps:$4 sm:$0xff]  }
  0xaa   :  { %1387 = vmatprep.subr.bf16.mxu0 %v2512_v24  ;;  %1551 = vmatprep.subr.bf16.mxu1 %v2515_v25  ;;  %v2594_v24 = vld [vmem:[#allocation2 + $0x5e0] ss:$16 sps:$4 sm:$0xff]   ;;  %v2597_v25 = vld [vmem:[#allocation2 + $0x5e8] ss:$16 sps:$4 sm:$0xff]  }
  0xab   :  { %1417 = vmatprep.mubr.bf16.mxu0 %v99_v31  ;;  %1581 = vmatprep.mubr.bf16.mxu1 %v99_v31  ;;  %v2607_v31 = vld [vmem:[#allocation5 + $0x40] sm:$0xff]  }
  0xad   :  { %1388 = vmatpush1.bf16.msra.mxu0 %v2510_v27  ;;  %1552 = vmatpush1.bf16.msra.mxu1 %v2513_v9  ;;  %v2603_v27 = vld [vmem:[#allocation2 + $0x604] ss:$16 sps:$4 sm:$0xff]   ;;  %v2606_v9 = vld [vmem:[#allocation2 + $0x60c] ss:$16 sps:$4 sm:$0xff]  }
  0xae   :  { %1389 = vmatprep.subr.bf16.mxu0 %v2518_v29  ;;  %1553 = vmatprep.subr.bf16.mxu1 %v2521_v30  ;;  %v2601_v29 = vld [vmem:[#allocation2 + $0x600] ss:$16 sps:$4 sm:$0xff]   ;;  %v2604_v30 = vld [vmem:[#allocation2 + $0x608] ss:$16 sps:$4 sm:$0xff]  }
  0xb1   :  { %1390 = vmatpush1.bf16.msra.mxu0 %v2516_v32  ;;  %1554 = vmatpush1.bf16.msra.mxu1 %v2519_v33  ;;  %v2608_v32 = vld [vmem:[#allocation5 + $0xc0] sm:$0xff]   ;;  %v71_v33 = vcombine.high %v2793_v23, %v2793_v23  ;;  %v2613_v23 = vld [vmem:[#allocation5 + $0x8] sm:$0xff]  }
  0xb2   :  { %1391 = vmatprep.subr.bf16.mxu0 %v2524_v34  ;;  %1555 = vmatprep.subr.bf16.mxu1 %v2527_v35  ;;  %v2718_v34 = vmov 0  }
  0xb3   :  { %v85_v26 = vrot.slane %v71_v33, %v2777_v49  ;;  %v2618_v49 = vld [vmem:[#allocation5 + $0x90] sm:$0xff]  }
  0xb5   :  { %1392 = vmatpush1.bf16.msra.mxu0 %v2522_v36  ;;  %1556 = vmatpush1.bf16.msra.mxu1 %v2525_v37  ;;  %v100_v35 = vpack.c.bf16 %v85_v26, %v85_v26  ;;  %v2609_v36 = vld [vmem:[#allocation5] sm:$0xff]  }
  0xb6   :  { %1393 = vmatprep.subr.bf16.mxu0 %v2530_v38  ;;  %1557 = vmatprep.subr.bf16.mxu1 %v2533_v39  ;;  %v2610_v37 = vld [vmem:[#allocation5 + $0x80] sm:$0xff]   ;;  %v2611_v38 = vld [vmem:[#allocation5 + $0x48] sm:$0xff]  }
  0xb7   :  { %v2612_v39 = vld [vmem:[#allocation5 + $0xc8] sm:$0xff]  }
  0xb9   :  { %1394 = vmatpush1.bf16.msra.mxu0 %v2528_v40  ;;  %1558 = vmatpush1.bf16.msra.mxu1 %v2531_v41  ;;  %v2614_v40 = vld [vmem:[#allocation5 + $0x88] sm:$0xff]   ;;  %v2615_v41 = vld [vmem:[#allocation5 + $0x50] sm:$0xff]  }
  0xba   :  { %1395 = vmatprep.subr.bf16.mxu0 %v2536_v42  ;;  %1559 = vmatprep.subr.bf16.mxu1 %v2539_v44  ;;  %v2616_v42 = vld [vmem:[#allocation5 + $0xd0] sm:$0xff]  }
  0xbb   :  { %v2617_v44 = vld [vmem:[#allocation5 + $0x10] sm:$0xff]  }
  0xbd   :  { %1396 = vmatpush1.bf16.msra.mxu0 %v2534_v45  ;;  %1560 = vmatpush1.bf16.msra.mxu1 %v2537_v46  ;;  %v2619_v45 = vld [vmem:[#allocation5 + $0x58] sm:$0xff]  }
  0xbe   :  { %1397 = vmatprep.subr.bf16.mxu0 %v2542_v47  ;;  %1561 = vmatprep.subr.bf16.mxu1 %v2545_v48  ;;  %v2620_v46 = vld [vmem:[#allocation5 + $0xd8] sm:$0xff]  }
  0xbf   :  { %v2621_v47 = vld [vmem:[#allocation5 + $0x18] sm:$0xff]  }
  0xc0   :  { %v2622_v48 = vld [vmem:[#allocation5 + $0x98] sm:$0xff]  }
  0xc1   :  { %1398 = vmatpush1.bf16.msra.mxu0 %v2540_v50  ;;  %1562 = vmatpush1.bf16.msra.mxu1 %v2543_v51  ;;  %v2623_v50 = vld [vmem:[#allocation5 + $0x60] sm:$0xff]  }
  0xc2   :  { %1399 = vmatprep.subr.bf16.mxu0 %v2548_v52  ;;  %1563 = vmatprep.subr.bf16.mxu1 %v2551_v53  ;;  %v2624_v51 = vld [vmem:[#allocation5 + $0xe0] sm:$0xff]  }
  0xc3   :  { %v2625_v52 = vld [vmem:[#allocation5 + $0x20] sm:$0xff]  }
  0xc4   :  { %v2626_v53 = vld [vmem:[#allocation5 + $0xa0] sm:$0xff]  }
  0xc5   :  { %1400 = vmatpush1.bf16.msra.mxu0 %v2546_v54  ;;  %1564 = vmatpush1.bf16.msra.mxu1 %v2549_v55  ;;  %v2627_v54 = vld [vmem:[#allocation5 + $0x68] sm:$0xff]  }
  0xc6   :  { %1401 = vmatprep.subr.bf16.mxu0 %v2554_v56  ;;  %1565 = vmatprep.subr.bf16.mxu1 %v2557_v57  ;;  %v2628_v55 = vld [vmem:[#allocation5 + $0xe8] sm:$0xff]  }
  0xc7   :  { %v2629_v56 = vld [vmem:[#allocation5 + $0x28] sm:$0xff]  }
  0xc8   :  { %v2630_v57 = vld [vmem:[#allocation5 + $0xa8] sm:$0xff]  }
  0xc9   :  { %1402 = vmatpush1.bf16.msra.mxu0 %v2552_v58  ;;  %1566 = vmatpush1.bf16.msra.mxu1 %v2555_v59  ;;  %v2631_v58 = vld [vmem:[#allocation5 + $0x70] sm:$0xff]  }
  0xca   :  { %1403 = vmatprep.subr.bf16.mxu0 %v2560_v60  ;;  %1567 = vmatprep.subr.bf16.mxu1 %v2563_v61  ;;  %v2632_v59 = vld [vmem:[#allocation5 + $0xf0] sm:$0xff]  }
  0xcb   :  { %v2633_v60 = vld [vmem:[#allocation5 + $0x30] sm:$0xff]  }
  0xcc   :  { %v2634_v61 = vld [vmem:[#allocation5 + $0xb0] sm:$0xff]  }
  0xcd   :  { %1404 = vmatpush1.bf16.msra.mxu0 %v2558_v62  ;;  %1568 = vmatpush1.bf16.msra.mxu1 %v2561_v63  ;;  %v2635_v62 = vld [vmem:[#allocation5 + $0x78] sm:$0xff]  }
  0xce   :  { %1405 = vmatprep.subr.bf16.mxu0 %v2566_v0  ;;  %1569 = vmatprep.subr.bf16.mxu1 %v2569_v1  ;;  %v2636_v63 = vld [vmem:[#allocation5 + $0xf8] sm:$0xff]  }
  0xcf   :  { %v2637_v0 = vld [vmem:[#allocation5 + $0x38] sm:$0xff]  }
  0xd0   :  { %v2638_v1 = vld [vmem:[#allocation5 + $0xb8] sm:$0xff]  }
  0xd1   :  { %1406 = vmatpush1.bf16.msra.mxu0 %v2564_v2  ;;  %1570 = vmatpush1.bf16.msra.mxu1 %v2567_v3  ;;  %v301_v2 = vsub.s32 0, %v2774_v43  ;;  %v309_v3 = vsub.s32 2, %v2774_v43 }
  0xd2   :  { %1407 = vmatprep.subr.bf16.mxu0 %v2572_v4  ;;  %1571 = vmatprep.subr.bf16.mxu1 %v2575_v5  ;;  %v297_v4 = vld [vmem:[%s2830_s2] sm:$0xf]  ;;  %v305_v5 = vsub.s32 1, %v2774_v43 }
  0xd5   :  { %1408 = vmatpush1.bf16.msra.mxu0 %v2570_v6  ;;  %1572 = vmatpush1.bf16.msra.mxu1 %v2573_v7  ;;  %v313_v6 = vsub.s32 3, %v2774_v43  ;;  %v302_v7 = vrot.slane %v297_v4, %v301_v2 }
  0xd6   :  { %1409 = vmatprep.subr.bf16.mxu0 %v2578_v8  ;;  %1573 = vmatprep.subr.bf16.mxu1 %v2581_v10  ;;  %v310_v8 = vrot.slane %v297_v4, %v309_v3  ;;  %v306_v10 = vrot.slane %v297_v4, %v305_v5 }
  0xd9   :  { %1410 = vmatpush1.bf16.msra.mxu0 %v2576_v11  ;;  %1574 = vmatpush1.bf16.msra.mxu1 %v2579_v12  ;;  %v314_v11 = vrot.slane %v297_v4, %v313_v6 }
  0xda   :  { %1411 = vmatprep.subr.bf16.mxu0 %v2584_v13  ;;  %1575 = vmatprep.subr.bf16.mxu1 %v2587_v14 }
  0xdd   :  { %1412 = vmatpush1.bf16.msra.mxu0 %v2582_v15  ;;  %1576 = vmatpush1.bf16.msra.mxu1 %v2585_v16 }
  0xde   :  { %1413 = vmatprep.subr.bf16.mxu0 %v2590_v17  ;;  %1577 = vmatprep.subr.bf16.mxu1 %v2593_v18 }
  0xe1   :  { %1414 = vmatpush1.bf16.msra.mxu0 %v2588_v19  ;;  %1578 = vmatpush1.bf16.msra.mxu1 %v2591_v20 }
  0xe2   :  { %1415 = vmatprep.subr.bf16.mxu0 %v2596_v21  ;;  %1579 = vmatprep.subr.bf16.mxu1 %v2599_v22 }
  0xe5   :  { %1416 = vmatpush1.bf16.msra.mxu0 %v2594_v24  ;;  %1580 = vmatpush1.bf16.msra.mxu1 %v2597_v25 }
  0xe6   :  { %1426 = vmatprep.subr.bf16.mxu0 %v2603_v27  ;;  %1590 = vmatprep.subr.bf16.mxu1 %v2606_v9 }
  0xe8   :  { %1418 = vmatmul.mubr.bf16.vlgmr.msra.gmra.mrb[0].mxu0 %v98_v28  ;;  %1582 = vmatmul.mubr.bf16.vlgmr.msra.gmra.mrb[0].mxu1 %v98_v28 }
  0xe9   :  { %1427 = vmatpush1.bf16.msra.mxu0 %v2601_v29  ;;  %1591 = vmatpush1.bf16.msra.mxu1 %v2604_v30 }
  0xea   :  { %1458 = vmatprep.mubr.bf16.mxu0 %v2718_v34  ;;  %1622 = vmatprep.mubr.bf16.mxu1 %v2718_v34  ;;  %v2197_v34 = vld [vmem:[%s2832_s4] ss:$0 sm:$0xff] }
  0xeb   :  { %2230 = vmatprep.subr.bf16.mxu0 %v2607_v31  ;;  %2252 = vmatprep.subr.bf16.mxu1 %v2608_v32 }
  0xf4   :  { %2195 = vmatmul.mubr.msk.bf16.vlgmr.msra.gmra.mrb[0].mxu0 %vm1299_vm0, %v100_v35  ;;  %2196 = vmatmul.mubr.msk.bf16.vlgmr.msra.gmra.mrb[0].mxu1 %vm1299_vm0, %v100_v35 }
  0xf5   :  { %2231 = vmatpush3.bf16.msra.mxu0 %v2609_v36  ;;  %2253 = vmatpush3.bf16.msra.mxu1 %v2610_v37 }
  0xf6   :  { %2232 = vmatprep.subr.bf16.mxu0 %v2611_v38  ;;  %2254 = vmatprep.subr.bf16.mxu1 %v2612_v39 }
  0xf9   :  { %2233 = vmatpush3.bf16.msra.mxu0 %v2613_v23  ;;  %2255 = vmatpush3.bf16.msra.mxu1 %v2614_v40 }
  0xfa   :  { %2234 = vmatprep.subr.bf16.mxu0 %v2615_v41  ;;  %2256 = vmatprep.subr.bf16.mxu1 %v2616_v42 }
  0xfd   :  { %2235 = vmatpush3.bf16.msra.mxu0 %v2617_v44  ;;  %2257 = vmatpush3.bf16.msra.mxu1 %v2618_v49 }
  0xfe   :  { %2236 = vmatprep.subr.bf16.mxu0 %v2619_v45  ;;  %2258 = vmatprep.subr.bf16.mxu1 %v2620_v46 }
 0x101   :  { %2237 = vmatpush3.bf16.msra.mxu0 %v2621_v47  ;;  %2259 = vmatpush3.bf16.msra.mxu1 %v2622_v48 }
 0x102   :  { %2238 = vmatprep.subr.bf16.mxu0 %v2623_v50  ;;  %2260 = vmatprep.subr.bf16.mxu1 %v2624_v51 }
 0x105   :  { %2239 = vmatpush3.bf16.msra.mxu0 %v2625_v52  ;;  %2261 = vmatpush3.bf16.msra.mxu1 %v2626_v53 }
 0x106   :  { %2240 = vmatprep.subr.bf16.mxu0 %v2627_v54  ;;  %2262 = vmatprep.subr.bf16.mxu1 %v2628_v55 }
 0x109   :  { %2241 = vmatpush3.bf16.msra.mxu0 %v2629_v56  ;;  %2263 = vmatpush3.bf16.msra.mxu1 %v2630_v57 }
 0x10a   :  { %2242 = vmatprep.subr.bf16.mxu0 %v2631_v58  ;;  %2264 = vmatprep.subr.bf16.mxu1 %v2632_v59 }
 0x10d   :  { %2243 = vmatpush3.bf16.msra.mxu0 %v2633_v60  ;;  %2265 = vmatpush3.bf16.msra.mxu1 %v2634_v61 }
 0x10e   :  { %2244 = vmatprep.subr.bf16.mxu0 %v2635_v62  ;;  %2266 = vmatprep.subr.bf16.mxu1 %v2636_v63 }
 0x111   :  { %2245 = vmatpush3.bf16.msra.mxu0 %v2637_v0  ;;  %2267 = vmatpush3.bf16.msra.mxu1 %v2638_v1 }
 0x1c7   :  { %v1460_v12 = vpop.f32.mrb[0].mxu0  ;;  %v1624_v13 = vpop.f32.mrb[0].mxu1 }
 0x1c8   :  { %v2274_v14 = vadd.f32 %v1460_v12, %v302_v7  ;;  %v2276_v15 = vadd.f32 %v1624_v13, %v310_v8  ;;  %v1462_v16 = vpop.f32.mrb[1].mxu0  ;;  %v1626_v17 = vpop.f32.mrb[1].mxu1 }
 0x1c9   :  { %v2275_v18 = vadd.f32 %v1462_v16, %v306_v10  ;;  %v2277_v19 = vadd.f32 %v1626_v17, %v314_v11  ;;  %v1464_v20 = vpop.f32.mrb[2].mxu0  ;;  %v1628_v21 = vpop.f32.mrb[2].mxu1 }
 0x1ca   :  { %v1631_v22 = vmax.f32 %v2274_v14, 0.0  ;;  %v1633_v24 = vmax.f32 %v2276_v15, 0.0  ;;  %v1465_v25 = vpop.f32.mrb[3].mxu0  ;;  %v1629_v27 = vpop.f32.mrb[3].mxu1 }
 0x1cb   :  { %v1632_v9 = vmax.f32 %v2275_v18, 0.0  ;;  %v1634_v43 = vmax.f32 %v2277_v19, 0.0 }
 0x1cc   :  { %v1635_v30 = vpack.c.bf16 %v1631_v22, %v1631_v22  ;;  %v1637_v31 = vpack.c.bf16 %v1633_v24, %v1633_v24 }
 0x1cd   :  { %v1636_v28 = vpack.c.bf16 %v1632_v9, %v1632_v9  ;;  %v1638_v29 = vpack.c.bf16 %v1634_v43, %v1634_v43 }
 0x1cf   :  { %1934 = vmatprep.mubr.bf16.mxu0 %v1636_v28  ;;  %1974 = vmatprep.mubr.bf16.mxu1 %v1638_v29 }
 0x1d0   :  { %1935 = vmatmul.mubr.bf16.vlgmr.msra.gmra.mrb[4].mxu0 %v1635_v30  ;;  %1975 = vmatmul.mubr.bf16.vlgmr.msra.gmra.mrb[4].mxu1 %v1637_v31 }
 0x2a3   :  { %v2246_v32 = vpop.f32.mrb[4].mxu0  ;;  %v2268_v33 = vpop.f32.mrb[4].mxu1 }
 0x2a4   :  { %v2247_v26 = vpop.f32.mrb[5].mxu0  ;;  %v2269_v35 = vpop.f32.mrb[5].mxu1 }
 0x2a5   :  { %v2248_v36 = vadd.f32 %v2247_v26, %v2246_v32  ;;  %v2270_v37 = vadd.f32 %v2269_v35, %v2268_v33  ;;  %v2249_v38 = vpop.f32.mrb[6].mxu0  ;;  %v2271_v39 = vpop.f32.mrb[6].mxu1 }
 0x2a6   :  { %v2250_v23 = vpop.f32.mrb[7].mxu0  ;;  %v2272_v40 = vpop.f32.mrb[7].mxu1 }
 0x2a7   :  { %v1937_v41 = vadd.f32 %v2248_v36, %v2197_v34 }
 0x2a9   :  { %v1977_v42 = vadd.f32 %v2270_v37, %v1937_v41 }
 0x2ab   :  { %1982 = vst [vmem:[#allocation7] sm:$0x3] %v1977_v42 }
 0x2ac   :  { %2694 = shalt.err (!%p2691_p6)
}
 0x2ad   :  { %s2695_s29 = scalar_lea.hbm %s2833_s5, 32 }
 0x2ae   :  { %p2696_p7 = scmp.ne.s32.totalorder %s2833_s5, %s2695_s29  ;;  %p2699_p8 = scmp.lt.u32.totalorder %s2695_s29, %s2833_s5 }
 0x2b0   :  { %p2701_p9 = pnand %p2699_p8, %p2696_p7 }
 0x2b2   :  { %2704 = shalt.err (!%p2701_p9)
}
 0x2b3   :  { %1992 = dma.vmem_to_hbm [thread:$0]  %s1990_s26, 32, %s2833_s5, [#allocation4]  }
 0x2b4   :  { %2709 = dma.done.wait [#allocation4], 32  }
 0x2b5   :  { %2710 = vsyncadd [#allocation4], 4294967264 }
 0x2b6   :  { %1996 = vsyncpa [#allocation3], 1 }
 0x2b7   :  { %1997 = vsyncpa [#allocation6], 1 }
 0x2b8   :  { %1998 = vsyncpa [#allocation4], 1 }

</bundles_post_ra>
